<compile_context>
chip_gen: v5e
topology: v5e:2x2
jax: 0.10.0
libtpu: 0.0.40
codegen_flags: <defaults>
</compile_context>

<pallas_src>
import functools
import math

import jax
import jax.numpy as jnp
from jax.experimental import pallas as pl
from jax.experimental.pallas import tpu as pltpu


def _repeat_kernel(x_ref, o_ref, *, times):
    # x_ref: (TB, D) input tile; o_ref: (TB, times*D) lane-dense output tile.
    # One broadcast per tile followed by a single big unmasked store.
    o_ref[...] = jnp.tile(x_ref[...], (1, times))


def _sublane_multiple(itemsize: int) -> int:
    # Sub-32-bit dtypes pack along sublanes: 8 rows for f32, 16 for bf16,
    # 32 for int8/fp8. Matching native tiling keeps the copy at full width.
    return max(8, 32 // itemsize)


def _choose_tiles(B, T, D, itemsize, target_bytes=8 << 20):
    """Pick (TB, CT): batch tile and repeat-axis chunk (CT divides T).

    Output block = (TB, CT*D), targeted at ~target_bytes so the fixed
    ~0.35 us per-grid-step overhead stays <10% of the writeback DMA.
    """
    sub = _sublane_multiple(itemsize)
    min_tb = B if B <= sub else sub

    # Lane chunking: only if even the minimal batch tile overshoots the
    # target. CT must divide T and keep CT*D a multiple of 128 lanes
    # (or CT == T) so the output block stays lane-dense / unmasked.
    CT = T
    if min_tb * T * D * itemsize > target_bytes:
        lane_align = 128 // math.gcd(D, 128)  # smallest CT with CT*D % 128 == 0
        candidates = [
            ct for ct in range(1, T + 1)
            if T % ct == 0 and (ct == T or ct % lane_align == 0)
        ]
        fitting = [ct for ct in candidates
                   if min_tb * ct * D * itemsize <= target_bytes]
        CT = max(fitting) if fitting else min(candidates)

    # Batch tile: fill up to ~target_bytes, rounded to the sublane multiple.
    block_row_bytes = CT * D * itemsize
    tb = max(1, target_bytes // block_row_bytes)
    if tb >= B:
        tb = B
    else:
        tb = min(B, max(sub, (tb // sub) * sub))

    # v7x has 2 TensorCores: prefer >= 2 grid steps so "parallel" batch tiles
    # can shard across cores. Costs one extra ~0.35 us step on v5e/v6e,
    # worth up to ~2x HBM write bandwidth on v7x when the grid would collapse.
    if tb == B and T // CT == 1 and B >= 2 * sub:
        tb = max(sub, ((B // 2) // sub) * sub)

    return tb, CT


def _vmem_limit_bytes(in_block_bytes: int, out_block_bytes: int) -> int:
    # Double-buffered in + out blocks plus slack, clamped to a safe fraction
    # of physical VMEM (v7x: 64 MiB -> 48 MiB cap; v5e/v6e: 128 -> 96 MiB).
    needed = 2 * (in_block_bytes + out_block_bytes) + (4 << 20)
    try:
        cap = (pltpu.get_tpu_info().vmem_capacity_bytes * 3) // 4
    except Exception:  # info unavailable (e.g. interpret mode)
        cap = 48 << 20
    return int(max(32 << 20, min(needed, cap)))


def repeat_vector(x: jax.Array, times_repeated: int) -> jax.Array:
    """x: (B, D) -> (B, times_repeated, D); matches x.unsqueeze(1).repeat(1, T, 1)."""
    B, D = x.shape
    T = int(times_repeated)
    itemsize = jnp.dtype(x.dtype).itemsize

    TB, CT = _choose_tiles(B, T, D, itemsize)
    grid = (pl.cdiv(B, TB), T // CT)

    in_block_bytes = TB * D * itemsize
    out_block_bytes = TB * CT * D * itemsize

    out_flat = pl.pallas_call(
        functools.partial(_repeat_kernel, times=CT),
        out_shape=jax.ShapeDtypeStruct((B, T * D), x.dtype),
        grid_spec=pltpu.PrefetchScalarGridSpec(
            num_scalar_prefetch=0,
            grid=grid,
            in_specs=[
                # Input tile follows the output's batch tile; re-fetched per
                # lane chunk (tiny vs. the output writeback).
                pl.BlockSpec((TB, D), lambda i, j: (i, 0)),
            ],
            # Lane-dense output slab, chunked along the repeat axis.
            out_specs=pl.BlockSpec((TB, CT * D), lambda i, j: (i, j)),
        ),
        compiler_params=pltpu.CompilerParams(
            dimension_semantics=("parallel", "parallel"),
            vmem_limit_bytes=_vmem_limit_bytes(in_block_bytes, out_block_bytes),
        ),
        # Advisory: this call is a pure memory op (read B*D, write B*T*D).
        cost_estimate=pl.CostEstimate(
            flops=0,
            transcendentals=0,
            bytes_accessed=(B * D + B * T * D) * itemsize,
        ),
    )(x)

    # Row-major (B, T*D) == (B, T, D); reshape is free.
    return out_flat.reshape(B, T, D)


if __name__ == "__main__":
    key = jax.random.PRNGKey(0)
    B, D = 2, 32
    times_repeated = 8

    x = jax.random.normal(key, (B, D), dtype=jnp.float32)

    out = repeat_vector(x, times_repeated)
    out = jax.block_until_ready(out)

    # Reference: pure-JAX equivalent of x.unsqueeze(1).repeat(1, T, 1)
    ref = jnp.broadcast_to(x[:, None, :], (B, times_repeated, D))

    assert out.shape == (B, times_repeated, D), out.shape
    assert out.dtype == x.dtype
    assert jnp.array_equal(out, ref), "mismatch vs reference"

    print("KERNEL_OK")
</pallas_src>

<mosaic_0001>
module attributes {stable_mosaic.version = 11 : i64} {
  func.func @_repeat_kernel(%arg0: i32, %arg1: i32, %arg2: memref<2x32xf32, #tpu.memory_space<vmem>>, %arg3: memref<2x256xf32, #tpu.memory_space<vmem>>) attributes {dimension_semantics = [#tpu.dimension_semantics<parallel>, #tpu.dimension_semantics<parallel>], iteration_bounds = array<i64: 1, 1>, scalar_prefetch = 0 : i64, scratch_operands = 0 : i64, tpu.core_type = #tpu.core_type<tc>, window_params = [{transform_indices = @transform_0, window_bounds = array<i64: 2, 32>}, {transform_indices = @transform_1, window_bounds = array<i64: 2, 256>}]} {
    %c0 = arith.constant 0 : index
    %c0_0 = arith.constant 0 : index
    %0 = vector.load %arg2[%c0, %c0_0] : memref<2x32xf32, #tpu.memory_space<vmem>>, vector<2x32xf32>
    %1 = tpu.concatenate %0, %0, %0, %0, %0, %0, %0, %0 in 1 : vector<2x32xf32>, vector<2x32xf32>, vector<2x32xf32>, vector<2x32xf32>, vector<2x32xf32>, vector<2x32xf32>, vector<2x32xf32>, vector<2x32xf32> -> vector<2x256xf32>
    %c0_1 = arith.constant 0 : index
    %c0_2 = arith.constant 0 : index
    %2 = vector.load %arg3[%c0_1, %c0_2] : memref<2x256xf32, #tpu.memory_space<vmem>>, vector<2x256xf32>
    tpu.vector_store %arg3[%c0_1, %c0_2], %1 {strides = array<i32>} : memref<2x256xf32, #tpu.memory_space<vmem>>, vector<2x256xf32>,
    return
  }
  func.func @transform_0(%arg0: i32, %arg1: i32) -> (i32, i32) {
    %c0_i32 = arith.constant 0 : i32
    %c0_i32_0 = arith.constant 0 : i32
    return %arg0, %c0_i32 : i32, i32
  }
  func.func @transform_1(%arg0: i32, %arg1: i32) -> (i32, i32) {
    %c0_i32 = arith.constant 0 : i32
    return %arg0, %arg1 : i32, i32
  }
}

</mosaic_0001>

<bundles_post_ra>
// kernel: tpu_custom_call.1
= control target key start
LH: loop header
LB: loop body
LE: loop exit
PB: predicated region body
PF: predicated region fallthrough
CT: control target
= control target key end

     0   :  { %6 = vsyncpa [#allocation3], 0  ;;  %s141_s0 = inlined_call_operand.hbm [shape: f32[2,32], index: 0, kind: input, shape index: {}]   ;;  %s142_s1 = inlined_call_operand.hbm [shape: f32[2,256], index: 1, kind: output, shape index: {}]  }
   0x1   :  { %7 = vsyncpa [#allocation4], 0  ;;  %s13_s8 = sshll.u32 %s141_s0, 4  ;;  %s120_s9 = smov [#allocation2]   ;;  %s14_s8 = int_to_ptr.hbm [resolvable:$true] %s13_s8 }
   0x2   :  { %s15_s10 = sshll.u32 %s120_s9, 4  ;;  %s16_s10 = int_to_ptr.vmem [resolvable:$true] %s15_s10 }
   0x3   :  { %18 = dma.hbm_to_vmem [thread:$0]  %s14_s8, 32, %s16_s10, [#allocation3]  }
   0x4   :  { %116 = dma.done.wait [#allocation3], 32  }
   0x5   :  { %117 = vsyncadd [#allocation3], 4294967264  ;;  %v23_v0 = vld [vmem:[#allocation2] sm:$0x3]  ;;  %s121_s11 = smov 32   ;;  %s122_s12 = smov 96  }
   0x6   :  { %25 = vrot.lane.b32.xlu0 %v23_v0, %s121_s11  ;;  %31 = vrot.lane.b32.xlu1 %v23_v0, %s122_s12  ;;  %s123_s13 = smov 64   ;;  %vm34_vm0 = vcmask 261120   ;;  %vm36_vm1 = vcmask 523264   ;;  %vm38_vm2 = vcmask 785408   ;;  %s124_s0 = smov [#allocation5]   ;;  %vm42_vm3 = vcmask 1041408  }
   0x7   :  { %s51_s14 = sshll.u32 %s124_s0, 4  ;;  %s53_s17 = sshll.u32 %s142_s1, 4  ;;  %s52_s14 = int_to_ptr.vmem [resolvable:$true] %s51_s14  ;;  %s54_s17 = int_to_ptr.hbm [resolvable:$true] %s53_s17 }
   0xe   :  { %28 = vrot.lane.b32.xlu0 %v23_v0, %s123_s13 }
  0x78   :  { %v26_v1 = vpop.permute.xlu0 %25  ;;  %v32_v2 = vpop.permute.xlu1 %31 }
  0x79   :  { %v35_v3 = vsel %vm34_vm0, %v23_v0, %v26_v1 }
  0x80   :  { %v29_v4 = vpop.permute.xlu0 %28 }
  0x81   :  { %v37_v5 = vsel %vm36_vm1, %v35_v3, %v29_v4 }
  0x82   :  { %v39_v6 = vsel %vm38_vm2, %v37_v5, %v32_v2 }
  0x83   :  { %v41_v7 = vrot.slane %v39_v6, 6 }
  0x85   :  { %v43_v8 = vsel %vm42_vm3, %v39_v6, %v41_v7 }
  0x86   :  { %45 = vst [vmem:[#allocation5] sm:$0xf] %v43_v8 }
  0x87   :  { %56 = dma.vmem_to_hbm [thread:$0]  %s52_s14, 64, %s54_s17, [#allocation4]  }
  0x88   :  { %118 = dma.done.wait [#allocation4], 64  }
  0x89   :  { %119 = vsyncadd [#allocation4], 4294967232 }
  0x8a   :  { %61 = vsyncpa [#allocation3], 1 }
  0x8b   :  { %62 = vsyncpa [#allocation4], 1 }

</bundles_post_ra>
